<compile_context>
chip_gen: v5e
topology: v5e:2x2
jax: 0.10.0
libtpu: 0.0.40
codegen_flags: <defaults>
</compile_context>

<pallas_src>
import jax
import jax.numpy as jnp
from jax.experimental import pallas as pl
from jax.experimental.pallas import tpu as pltpu


_LANE = 128                              # TPU vreg lane width
_ROW_ALIGN = 32                          # sublane-packing-safe row multiple (f32/bf16/i8)
_MAX_BLOCK_LANES = 64                    # block width <= 64*128 = 8192 elements
_TARGET_BLOCK_BYTES = 4 * 1024 * 1024    # ~4 MiB per block
_VMEM_LIMIT_BYTES = 32 * 1024 * 1024     # safe on v5e/v6e/v7x


def _identity_kernel(x_ref, o_ref):
    # Hot path: copy the current VMEM tile (output buffer is aliased to input).
    o_ref[...] = x_ref[...]


def identity(x: jax.Array) -> jax.Array:
    """Pallas identity: y = x, same shape/dtype."""
    if x.size == 0:
        # Nothing to copy.
        return x

    orig_shape = x.shape
    orig_dtype = x.dtype
    n = x.size
    itemsize = jnp.dtype(orig_dtype).itemsize

    # ---- Choose a lane-dense 2D layout (R_pad, C) with C a multiple of 128 ----
    n_lanes = pl.cdiv(n, _LANE)
    c_lanes = min(n_lanes, _MAX_BLOCK_LANES)
    C = c_lanes * _LANE                       # 128 <= C <= 8192, multiple of 128
    R = pl.cdiv(n, C)

    # ---- Row tile sized by bytes (~4 MiB), multiple of 32 rows ----
    tr = max(1, _TARGET_BLOCK_BYTES // (C * itemsize))
    tr = max(_ROW_ALIGN, (tr // _ROW_ALIGN) * _ROW_ALIGN)
    if tr >= R:
        tr = R                               # whole thing fits one block -> grid of 1
        R_pad = R
    else:
        R_pad = pl.cdiv(R, tr) * tr          # pad rows so the grid divides evenly

    padded_n = R_pad * C
    flat = x.reshape(-1)
    if padded_n != n:
        flat = jnp.pad(flat, (0, padded_n - n))
    x2 = flat.reshape(R_pad, C)

    grid = (R_pad // tr,)

    out = pl.pallas_call(
        _identity_kernel,
        out_shape=jax.ShapeDtypeStruct((R_pad, C), orig_dtype),
        grid_spec=pltpu.PrefetchScalarGridSpec(
            num_scalar_prefetch=0,
            grid=grid,
            in_specs=[pl.BlockSpec((tr, C), lambda i: (i, 0))],
            out_specs=pl.BlockSpec((tr, C), lambda i: (i, 0)),
        ),
        # Donate the input buffer to the output: no second HBM allocation and,
        # when the caller donates, no extra round-trip.
        input_output_aliases={0: 0},
        compiler_params=pltpu.CompilerParams(
            dimension_semantics=("parallel",),   # shards across v7x's 2 TCs
            vmem_limit_bytes=_VMEM_LIMIT_BYTES,
        ),
    )(x2)

    out_flat = out.reshape(-1)
    if padded_n != n:
        out_flat = out_flat[:n]
    return out_flat.reshape(orig_shape)


if __name__ == "__main__":
    key = jax.random.PRNGKey(0)
    # Shape from the nn.Identity docstring example: torch.randn(128, 20).
    x = jax.random.normal(key, (128, 20), dtype=jnp.float32)

    y = identity(x)
    jax.block_until_ready(y)

    assert y.shape == x.shape and y.dtype == x.dtype
    assert bool(jnp.all(y == x))
    print("KERNEL_OK")
</pallas_src>

<mosaic_0001>
module attributes {stable_mosaic.version = 11 : i64} {
  func.func @_identity_kernel(%arg0: i32, %arg1: memref<1x2560xf32, #tpu.memory_space<vmem>>, %arg2: memref<1x2560xf32, #tpu.memory_space<vmem>>) attributes {dimension_semantics = [#tpu.dimension_semantics<parallel>], iteration_bounds = array<i64: 1>, scalar_prefetch = 0 : i64, scratch_operands = 0 : i64, tpu.core_type = #tpu.core_type<tc>, window_params = [{transform_indices = @transform_0, window_bounds = array<i64: 1, 2560>}, {transform_indices = @transform_1, window_bounds = array<i64: 1, 2560>}]} {
    %c0 = arith.constant 0 : index
    %c0_0 = arith.constant 0 : index
    %0 = vector.load %arg1[%c0, %c0_0] : memref<1x2560xf32, #tpu.memory_space<vmem>>, vector<1x2560xf32>
    %c0_1 = arith.constant 0 : index
    %c0_2 = arith.constant 0 : index
    %1 = vector.load %arg2[%c0_1, %c0_2] : memref<1x2560xf32, #tpu.memory_space<vmem>>, vector<1x2560xf32>
    tpu.vector_store %arg2[%c0_1, %c0_2], %0 {strides = array<i32>} : memref<1x2560xf32, #tpu.memory_space<vmem>>, vector<1x2560xf32>,
    return
  }
  func.func @transform_0(%arg0: i32) -> (i32, i32) {
    %c0_i32 = arith.constant 0 : i32
    %c0_i32_0 = arith.constant 0 : i32
    return %arg0, %c0_i32 : i32, i32
  }
  func.func @transform_1(%arg0: i32) -> (i32, i32) {
    %c0_i32 = arith.constant 0 : i32
    %c0_i32_0 = arith.constant 0 : i32
    return %arg0, %c0_i32 : i32, i32
  }
}

</mosaic_0001>

<bundles_post_ra>
// kernel: tpu_custom_call.1
= control target key start
LH: loop header
LB: loop body
LE: loop exit
PB: predicated region body
PF: predicated region fallthrough
CT: control target
= control target key end

     0   :  { %6 = vsyncpa [#allocation3], 0  ;;  %s122_s0 = inlined_call_operand.hbm [shape: f32[1,2560], index: 0, kind: input, shape index: {}, may-alias: {0,1}]   ;;  %s123_s1 = inlined_call_operand.hbm [shape: f32[1,2560], index: 1, kind: output, shape index: {}, may-alias: {0,1}]  }
   0x1   :  { %7 = vsyncpa [#allocation4], 0  ;;  %s13_s8 = sshll.u32 %s122_s0, 4  ;;  %s104_s9 = smov [#allocation2]   ;;  %s14_s8 = int_to_ptr.hbm [resolvable:$true] %s13_s8 }
   0x2   :  { %s15_s10 = sshll.u32 %s104_s9, 4  ;;  %s16_s10 = int_to_ptr.vmem [resolvable:$true] %s15_s10 }
   0x3   :  { %18 = dma.hbm_to_vmem [thread:$0]  %s14_s8, 320, %s16_s10, [#allocation3]  }
   0x4   :  { %100 = dma.done.wait [#allocation3], 320  }
   0x5   :  { %101 = vsyncadd [#allocation3], 4294966976  ;;  %v28_v0 = vlaneseq  ;;  %s105_s11 = smov [#allocation5]   ;;  %s40_s15 = sshll.u32 %s123_s1, 4  ;;  %v23_v1 = vld [vmem:[#allocation2] sm:$0xff]  ;;  %v24_v2 = vld [vmem:[#allocation2 + $0x8] sm:$0xff]  ;;  %s41_s15 = int_to_ptr.hbm [resolvable:$true] %s40_s15 }
   0x6   :  { %s38_s12 = sshll.u32 %s105_s11, 4  ;;  %v25_v3 = vld [vmem:[#allocation2 + $0x10] sm:$0xf]  ;;  %26 = vst [vmem:[#allocation5] sm:$0xff] %v23_v1  ;;  %s39_s12 = int_to_ptr.vmem [resolvable:$true] %s38_s12 }
   0x7   :  { %vm30_vm0 = vcmp.lt.s32.totalorder %v28_v0, 512  ;;  %27 = vst [vmem:[#allocation5 + $0x8] sm:$0xff] %v24_v2 }
   0x8   :  { %32 = vst.msk [vmem:[#allocation5 + $0x10] sm:$0xf] %vm30_vm0, %v25_v3 }
   0x9   :  { %43 = dma.vmem_to_hbm [thread:$0]  %s39_s12, 320, %s41_s15, [#allocation4]  }
   0xa   :  { %102 = dma.done.wait [#allocation4], 320  }
   0xb   :  { %103 = vsyncadd [#allocation4], 4294966976 }
   0xc   :  { %48 = vsyncpa [#allocation3], 1 }
   0xd   :  { %49 = vsyncpa [#allocation4], 1 }

</bundles_post_ra>
